<compile_context>
chip_gen: v7x
topology: tpu7x:2x2x1
jax: 0.10.0
libtpu: 0.0.40
codegen_flags: <defaults>
</compile_context>

<pallas_src>
import functools

import jax
import jax.numpy as jnp
from jax.experimental import pallas as pl
from jax.experimental.pallas import tpu as pltpu

_VMEM_BUDGET = 28 * 1024 * 1024  # conservative tile budget (fits v7x scoped VMEM)
_VMEM_LIMIT = 32 * 1024 * 1024   # explicit scoped-VMEM request


def _round_up(a, b):
    return ((a + b - 1) // b) * b


# --------------------------- kernels ---------------------------------------


def _lt_fullk_kernel(x_ref, v_ref, ixn_ref, ivn_ref, o_ref):
    """Full-K variant: whole contraction dim in one block, no accumulator."""
    acc = jnp.dot(x_ref[...], v_ref[...], preferred_element_type=jnp.float32)
    # Row scaling by 1/||x_b||, column scaling by 1/||v_:,n||.
    o_ref[...] = (acc * (ixn_ref[...] * ivn_ref[...])).astype(o_ref.dtype)


def _lt_acc_kernel(x_ref, v_ref, ixn_ref, ivn_ref, o_ref, acc_ref):
    """General variant: K streamed over the innermost ('arbitrary') grid axis."""
    k = pl.program_id(2)

    @pl.when(k == 0)
    def _():
        acc_ref[...] = jnp.zeros_like(acc_ref)

    acc_ref[...] += jnp.dot(
        x_ref[...], v_ref[...], preferred_element_type=jnp.float32
    )

    @pl.when(k == pl.num_programs(2) - 1)
    def _():
        o_ref[...] = (acc_ref[...] * (ixn_ref[...] * ivn_ref[...])).astype(
            o_ref.dtype
        )


# --------------------------- tile selection ---------------------------------


def _pick_tiles(B, K, N, mm_bytes, out_bytes, force=None):
    """Choose kernel variant and tile sizes under the VMEM budget."""
    Kp128 = _round_up(K, 128)
    Np128 = _round_up(N, 128)
    tm = min(512, _round_up(B, 8))

    def fullk_bytes(tn):
        return (
            2 * tm * Kp128 * mm_bytes      # x block, double-buffered
            + 2 * Kp128 * tn * mm_bytes    # v block, double-buffered
            + 2 * tm * tn * out_bytes      # out block, double-buffered
            + 2 * (tm + tn) * 4            # norm vectors
        )

    if force != "acc":
        tn = min(1024, Np128)
        while tn > 128 and fullk_bytes(tn) > _VMEM_BUDGET:
            tn = _round_up(tn // 2, 128)
        if force == "fullk" or fullk_bytes(tn) <= _VMEM_BUDGET:
            return "fullk", tm, tn, Kp128

    def acc_bytes(tn, tk):
        return (
            2 * tm * tk * mm_bytes
            + 2 * tk * tn * mm_bytes
            + tm * tn * 4                 # f32 accumulator scratch
            + 2 * tm * tn * out_bytes
            + 2 * (tm + tn) * 4
        )

    tn = min(1024, Np128)
    tk = min(1024, Kp128)
    while tk > 256 and acc_bytes(tn, tk) > _VMEM_BUDGET:
        tk = _round_up(tk // 2, 128)
    while tn > 256 and acc_bytes(tn, tk) > _VMEM_BUDGET:
        tn = _round_up(tn // 2, 128)
    return "acc", tm, tn, tk


# --------------------------- wrapper ----------------------------------------


@functools.partial(
    jax.jit,
    static_argnames=("use_bf16", "out_dtype", "force_variant", "tm", "tn", "tk"),
)
def linear_transform(
    x,
    v,
    *,
    use_bf16=True,
    out_dtype=jnp.float32,
    force_variant=None,
    tm=None,
    tn=None,
    tk=None,
):
    """Forward pass of LinearTransform.

    x: (B, K) activations.
    v: (K, N) transposed nn.Linear weight (i.e. weight.T).
    Returns (B, N) in out_dtype (default float32).
    """
    B, K = x.shape
    Kv, N = v.shape
    assert K == Kv

    mm_dtype = jnp.bfloat16 if use_bf16 else jnp.float32
    mm_bytes = 2 if use_bf16 else 4
    out_bytes = jnp.dtype(out_dtype).itemsize

    variant, tm_a, tn_a, tk_a = _pick_tiles(
        B, K, N, mm_bytes, out_bytes, force_variant
    )
    tn_user = tn is not None
    tm = tm_a if tm is None else min(tm, _round_up(B, 8))
    tn = tn_a if tn is None else min(tn, _round_up(N, 128))
    tk = tk_a if tk is None else min(tk, _round_up(K, 128))

    # v7x has 2 TensorCores: make sure at least one 'parallel' axis has >= 2
    # blocks when the problem allows it (only when tn was auto-picked).
    if (
        not tn_user
        and _round_up(B, tm) // tm == 1
        and _round_up(N, tn) // tn == 1
        and tn > 128
    ):
        tn = _round_up(tn // 2, 128)

    Bp = _round_up(B, tm)
    Np = _round_up(N, tn)
    Kp = _round_up(K, 128) if variant == "fullk" else _round_up(K, tk)

    # Reciprocal L2 norms with f32 accumulation, computed once in the wrapper
    # (fused with the pad + cast pass under jit).
    # eps matches F.normalize's clamp (1e-12); the same clamp is applied to the
    # weight columns as a deliberate NaN guard for degenerate all-zero rows.
    eps2 = jnp.float32(1e-24)  # (1e-12)^2
    xf32 = x.astype(jnp.float32)
    vf32 = v.astype(jnp.float32)
    inv_xnorm = jax.lax.rsqrt(
        jnp.maximum(jnp.sum(xf32 * xf32, axis=1, keepdims=True), eps2)
    )  # (B, 1)
    inv_vnorm = jax.lax.rsqrt(
        jnp.maximum(jnp.sum(vf32 * vf32, axis=0, keepdims=True), eps2)
    )  # (1, N)

    def pad2(a, rows, cols):
        if rows == a.shape[0] and cols == a.shape[1]:
            return a
        return jnp.pad(a, ((0, rows - a.shape[0]), (0, cols - a.shape[1])))

    x_in = pad2(x, Bp, Kp).astype(mm_dtype)
    v_in = pad2(v, Kp, Np).astype(mm_dtype)
    ixn = pad2(inv_xnorm, Bp, 1)
    ivn = pad2(inv_vnorm, 1, Np)

    cost = pl.CostEstimate(
        flops=2 * Bp * Np * Kp,
        transcendentals=0,
        bytes_accessed=mm_bytes * (Bp * Kp + Kp * Np)
        + out_bytes * Bp * Np
        + 4 * (Bp + Np),
    )

    if variant == "fullk":
        n_i, n_j = Bp // tm, Np // tn
        # Pick grid order to minimize HBM re-streaming: the operand indexed by
        # the OUTER axis is effectively resident (fetched once per outer step).
        extra_i_outer = Kp * Np * mm_bytes * (n_i - 1)  # weight re-reads
        extra_j_outer = Bp * Kp * mm_bytes * (n_j - 1)  # x re-reads
        if extra_i_outer <= extra_j_outer:
            grid = (n_i, n_j)
            x_map = lambda i, j: (i, 0)
            v_map = lambda i, j: (0, j)
            ixn_map = lambda i, j: (i, 0)
            ivn_map = lambda i, j: (0, j)
            o_map = lambda i, j: (i, j)
        else:
            grid = (n_j, n_i)
            x_map = lambda j, i: (i, 0)
            v_map = lambda j, i: (0, j)
            ixn_map = lambda j, i: (i, 0)
            ivn_map = lambda j, i: (0, j)
            o_map = lambda j, i: (i, j)

        out = pl.pallas_call(
            _lt_fullk_kernel,
            out_shape=jax.ShapeDtypeStruct((Bp, Np), out_dtype),
            grid_spec=pltpu.PrefetchScalarGridSpec(
                num_scalar_prefetch=0,
                grid=grid,
                in_specs=[
                    pl.BlockSpec((tm, Kp), x_map),
                    pl.BlockSpec((Kp, tn), v_map),
                    pl.BlockSpec((tm, 1), ixn_map),
                    pl.BlockSpec((1, tn), ivn_map),
                ],
                out_specs=pl.BlockSpec((tm, tn), o_map),
            ),
            compiler_params=pltpu.CompilerParams(
                dimension_semantics=("parallel", "parallel"),
                vmem_limit_bytes=_VMEM_LIMIT,
            ),
            cost_estimate=cost,
        )(x_in, v_in, ixn, ivn)
    else:
        grid = (Bp // tm, Np // tn, Kp // tk)
        out = pl.pallas_call(
            _lt_acc_kernel,
            out_shape=jax.ShapeDtypeStruct((Bp, Np), out_dtype),
            grid_spec=pltpu.PrefetchScalarGridSpec(
                num_scalar_prefetch=0,
                grid=grid,
                in_specs=[
                    pl.BlockSpec((tm, tk), lambda i, j, k: (i, k)),
                    pl.BlockSpec((tk, tn), lambda i, j, k: (k, j)),
                    pl.BlockSpec((tm, 1), lambda i, j, k: (i, 0)),
                    pl.BlockSpec((1, tn), lambda i, j, k: (0, j)),
                ],
                out_specs=pl.BlockSpec((tm, tn), lambda i, j, k: (i, j)),
                scratch_shapes=[pltpu.VMEM((tm, tn), jnp.float32)],
            ),
            compiler_params=pltpu.CompilerParams(
                dimension_semantics=("parallel", "parallel", "arbitrary"),
                vmem_limit_bytes=_VMEM_LIMIT,
            ),
            cost_estimate=cost,
        )(x_in, v_in, ixn, ivn)

    if Bp != B or Np != N:
        out = out[:B, :N]
    return out


# --------------------------- reference & test --------------------------------


def _reference(x, v):
    x_hat = x / jnp.maximum(
        jnp.sqrt(jnp.sum(x * x, axis=1, keepdims=True)), 1e-12
    )
    v_hat = v / jnp.sqrt(jnp.sum(v * v, axis=0, keepdims=True))
    return x_hat @ v_hat


if __name__ == "__main__":
    # Small shapes consistent with the module (input_dim / output_dim scaled down).
    B, input_dim, output_dim = 8, 256, 256

    key = jax.random.PRNGKey(0)
    kx, kv = jax.random.split(key)
    x = jax.random.normal(kx, (B, input_dim), dtype=jnp.float32)
    # nn.Linear weight is (output_dim, input_dim); the kernel takes it transposed.
    v = jax.random.normal(kv, (input_dim, output_dim), dtype=jnp.float32) * 0.02

    y_ref = _reference(x, v)

    # 1) f32 matmul path, auto-selected full-K (no accumulator) kernel.
    y32 = linear_transform(x, v, use_bf16=False)
    jax.block_until_ready(y32)
    assert y32.shape == (B, output_dim)
    assert jnp.allclose(y32, y_ref, atol=1e-4, rtol=1e-4)

    # 2) bf16 MXU path, forced accumulator kernel with multiple K steps
    #    (exercises the 3-D grid + f32 VMEM accumulator).
    y16 = linear_transform(
        x, v, use_bf16=True, force_variant="acc", tn=128, tk=128
    )
    jax.block_until_ready(y16)
    assert y16.shape == (B, output_dim)
    assert jnp.allclose(y16, y_ref, atol=5e-3, rtol=5e-2)

    # 3) bf16 MXU path, auto-selected full-K kernel.
    y16b = linear_transform(x, v, use_bf16=True)
    jax.block_until_ready(y16b)
    assert y16b.shape == (B, output_dim)
    assert jnp.allclose(y16b, y_ref, atol=5e-3, rtol=5e-2)

    print("KERNEL_OK")
</pallas_src>

<mosaic_0001>
module attributes {stable_mosaic.version = 11 : i64} {
  func.func @_lt_fullk_kernel(%arg0: i32, %arg1: i32, %arg2: memref<8x256xf32, #tpu.memory_space<vmem>>, %arg3: memref<256x128xf32, #tpu.memory_space<vmem>>, %arg4: memref<8x1xf32, #tpu.memory_space<vmem>>, %arg5: memref<1x128xf32, #tpu.memory_space<vmem>>, %arg6: memref<8x128xf32, #tpu.memory_space<vmem>>) attributes {dimension_semantics = [#tpu.dimension_semantics<parallel>, #tpu.dimension_semantics<parallel>], iteration_bounds = array<i64: 1, 2>, scalar_prefetch = 0 : i64, scratch_operands = 0 : i64, tpu.core_type = #tpu.core_type<tc>, window_params = [{transform_indices = @transform_0, window_bounds = array<i64: 8, 256>}, {transform_indices = @transform_1, window_bounds = array<i64: 256, 128>}, {transform_indices = @transform_2, window_bounds = array<i64: 8, 1>}, {transform_indices = @transform_3, window_bounds = array<i64: 1, 128>}, {transform_indices = @transform_4, window_bounds = array<i64: 8, 128>}]} {
    %c0 = arith.constant 0 : index
    %c0_0 = arith.constant 0 : index
    %0 = vector.load %arg2[%c0, %c0_0] : memref<8x256xf32, #tpu.memory_space<vmem>>, vector<8x256xf32>
    %c0_1 = arith.constant 0 : index
    %c0_2 = arith.constant 0 : index
    %1 = vector.load %arg3[%c0_1, %c0_2] : memref<256x128xf32, #tpu.memory_space<vmem>>, vector<256x128xf32>
    %cst = arith.constant dense<0.000000e+00> : vector<8x128xf32>
    %2 = tpu.matmul %0, %1, %cst {dimension_numbers = #tpu.dot_dimension_numbers<[1], [0], [0], [1], [0, 0, 1, 1], [], []>} : vector<8x256xf32>, vector<256x128xf32>, vector<8x128xf32> -> vector<8x128xf32>
    %c0_3 = arith.constant 0 : index
    %c0_4 = arith.constant 0 : index
    %3 = vector.load %arg4[%c0_3, %c0_4] : memref<8x1xf32, #tpu.memory_space<vmem>>, vector<8x1xf32>
    %c0_5 = arith.constant 0 : index
    %c0_6 = arith.constant 0 : index
    %4 = vector.load %arg5[%c0_5, %c0_6] : memref<1x128xf32, #tpu.memory_space<vmem>>, vector<1x128xf32>
    %5 = vector.broadcast %3 : vector<8x1xf32> to vector<8x128xf32>
    %6 = vector.broadcast %4 : vector<1x128xf32> to vector<8x128xf32>
    %7 = arith.mulf %5, %6 : vector<8x128xf32>
    %8 = arith.mulf %2, %7 : vector<8x128xf32>
    %c0_7 = arith.constant 0 : index
    %c0_8 = arith.constant 0 : index
    %9 = vector.load %arg6[%c0_7, %c0_8] : memref<8x128xf32, #tpu.memory_space<vmem>>, vector<8x128xf32>
    tpu.vector_store %arg6[%c0_7, %c0_8], %8 {strides = array<i32>} : memref<8x128xf32, #tpu.memory_space<vmem>>, vector<8x128xf32>,
    return
  }
  func.func @transform_0(%arg0: i32, %arg1: i32) -> (i32, i32) {
    %c0_i32 = arith.constant 0 : i32
    %c0_i32_0 = arith.constant 0 : i32
    return %arg0, %c0_i32 : i32, i32
  }
  func.func @transform_1(%arg0: i32, %arg1: i32) -> (i32, i32) {
    %c0_i32 = arith.constant 0 : i32
    %c0_i32_0 = arith.constant 0 : i32
    return %c0_i32, %arg1 : i32, i32
  }
  func.func @transform_2(%arg0: i32, %arg1: i32) -> (i32, i32) {
    %c0_i32 = arith.constant 0 : i32
    %c0_i32_0 = arith.constant 0 : i32
    return %arg0, %c0_i32 : i32, i32
  }
  func.func @transform_3(%arg0: i32, %arg1: i32) -> (i32, i32) {
    %c0_i32 = arith.constant 0 : i32
    %c0_i32_0 = arith.constant 0 : i32
    return %c0_i32, %arg1 : i32, i32
  }
  func.func @transform_4(%arg0: i32, %arg1: i32) -> (i32, i32) {
    %c0_i32 = arith.constant 0 : i32
    return %arg0, %arg1 : i32, i32
  }
}

</mosaic_0001>

<bundles_post_ra>
// kernel: linear_transform.1
= control target key start
LH: loop header
LB: loop body
LE: loop exit
PB: predicated region body
PF: predicated region fallthrough
CT: control target
= control target key end

     0   :  { %9 = vsyncpa [#allocation4], 0  ;;  %s1154_s0 = inlined_call_operand.vmem [shape: f32[8,256], index: 0, kind: input, shape index: {}]   ;;  %s1155_s1 = inlined_call_operand.vmem [shape: f32[256,256], index: 1, kind: input, shape index: {}]   ;;  %s1156_s2 = inlined_call_operand.vmem [shape: f32[8,1], index: 2, kind: input, shape index: {}]   ;;  %s1157_s3 = inlined_call_operand.vmem [shape: f32[1,256], index: 3, kind: input, shape index: {}]   ;;  %s1158_s4 = inlined_call_operand.hbm [shape: f32[8,256], index: 4, kind: output, shape index: {}]  }
   0x1   :  { %11 = vsyncpa [#allocation4 + $0x1], 0  ;;  %s916_s15 = smov 0   ;;  %s918_s16 = smov 0  }
   0x2   :  { %s920_s17 = smov 0   ;;  %s922_s18 = smov 0  }
   0x3   :  { %s924_s19 = smov 0   ;;  %s926_s20 = smov 0  }
   0x4 LB: > { %s669_s21 = sadd.s32 4294967295, %s887_s20   ;;  %s670_s22 = sadd.s32 4294967294, %s887_s20   ;;  %s887_s20 = sphi %s926_s20, %s17_s20   ;;  %s883_s19 = sphi %s924_s19, %s1165_s19   ;;  %s879_s18 = sphi %s922_s18, %s1164_s18   ;;  %s875_s17 = sphi %s920_s17, %s1163_s17   ;;  %s871_s16 = sphi %s918_s16, %s1162_s16   ;;  %s867_s15 = sphi %s916_s15, %s1161_s15  }
   0x5   : > { %s26_s23 = sadd.s32 1, %s883_s19  ;;  %s62_s24 = sadd.s32 1, %s875_s17 }
   0x6   : > { %p27_p0 = scmp.ge.s32.totalorder %s26_s23, 2  ;;  %p69_p1 = scmp.ne.s32.totalorder %s875_s17, %s871_s16 }
   0x7   : > { %p70_p2 = scmp.eq.s32.totalorder %s887_s20, 0  ;;  %p153_p3 = scmp.eq.s32.totalorder %s669_s21, 1 }
   0x8   : > { %s1167_s23 = smov (%p27_p0, %s26_s23), 0  ;;  %p158_p6 = scmp.ne.s32.totalorder %s871_s16, %s867_s15 }
   0x9   : > { %p71_p4 = por %p70_p2, %p69_p1  ;;  %p955_p5 = por %p153_p3, %p69_p1 }
   0xa   : > { %s59_s26 = ssub.s32 %s883_s19, %s1167_s23  ;;  %p159_p8 = scmp.eq.s32.totalorder %s670_s22, 1 }
   0xb   : > { %p60_p7 = scmp.eq.s32.totalorder %s59_s26, 0  ;;  %p674_p10 = scmp.ge.s32.totalorder %s887_s20, 2 }
   0xc   : > { %p966_p9 = por %p159_p8, %p158_p6 }
   0xd   : > { %s964_s27 = scalar_select %p60_p7, %s875_s17, %s62_s24  }
   0xe   : > { %190 = sbr.rel (%p674_p10) target bundleno = 41 (0x29), region = 24 }
  0x15   : > { %193 = sbr.rel (!%p71_p4) target bundleno = 41 (0x29), region = 28  ;;  %s195_s29 = sand.u32 (%p71_p4), 1, %s875_s17  }
  0x16   : > { %s676_s30 = sshll.u32 (%p71_p4), %s883_s19, 3  ;;  %s675_s5 = sshll.u32 (%p71_p4), %s195_s29, 8 }
  0x17   : > { %s978_s8 = scalar_lea.vmem (%p71_p4), %s1155_s1, %s676_s30  ;;  %s983_s9 = scalar_lea.vmem (%p71_p4), [#allocation2], %s675_s5 }
  0x18   : > { %v289_v0 = vld [vmem:[%s978_s8] sm:$0xff] (%p71_p4)  ;;  %v291_v1 = vld [vmem:[%s978_s8 + $0x10] sm:$0xff] (%p71_p4) }
  0x19   : > { %v293_v2 = vld [vmem:[%s978_s8 + $0x20] sm:$0xff] (%p71_p4)  ;;  %290 = vst [vmem:[%s983_s9] sm:$0xff] (%p71_p4), %v289_v0  ;;  %292 = vst [vmem:[%s983_s9 + $0x8] sm:$0xff] (%p71_p4), %v291_v1  ;;  %v295_v3 = vld [vmem:[%s978_s8 + $0x30] sm:$0xff] (%p71_p4) }
  0x1a   : > { %294 = vst [vmem:[%s983_s9 + $0x10] sm:$0xff] (%p71_p4), %v293_v2  ;;  %v297_v4 = vld [vmem:[%s978_s8 + $0x40] sm:$0xff] (%p71_p4)  ;;  %v299_v5 = vld [vmem:[%s978_s8 + $0x50] sm:$0xff] (%p71_p4)  ;;  %296 = vst [vmem:[%s983_s9 + $0x18] sm:$0xff] (%p71_p4), %v295_v3 }
  0x1b   : > { %298 = vst [vmem:[%s983_s9 + $0x20] sm:$0xff] (%p71_p4), %v297_v4  ;;  %300 = vst [vmem:[%s983_s9 + $0x28] sm:$0xff] (%p71_p4), %v299_v5  ;;  %v301_v6 = vld [vmem:[%s978_s8 + $0x60] sm:$0xff] (%p71_p4)  ;;  %v303_v7 = vld [vmem:[%s978_s8 + $0x70] sm:$0xff] (%p71_p4) }
  0x1c   : > { %v305_v8 = vld [vmem:[%s978_s8 + $0x80] sm:$0xff]  ;;  %302 = vst [vmem:[%s983_s9 + $0x30] sm:$0xff] %v301_v6  ;;  %304 = vst [vmem:[%s983_s9 + $0x38] sm:$0xff] %v303_v7  ;;  %v307_v9 = vld [vmem:[%s978_s8 + $0x90] sm:$0xff] }
  0x1d   : > { %306 = vst [vmem:[%s983_s9 + $0x40] sm:$0xff] %v305_v8  ;;  %v309_v10 = vld [vmem:[%s978_s8 + $0xa0] sm:$0xff]  ;;  %v311_v11 = vld [vmem:[%s978_s8 + $0xb0] sm:$0xff]  ;;  %308 = vst [vmem:[%s983_s9 + $0x48] sm:$0xff] %v307_v9 }
  0x1e   : > { %310 = vst [vmem:[%s983_s9 + $0x50] sm:$0xff] %v309_v10  ;;  %312 = vst [vmem:[%s983_s9 + $0x58] sm:$0xff] %v311_v11  ;;  %v313_v12 = vld [vmem:[%s978_s8 + $0xc0] sm:$0xff]  ;;  %v315_v13 = vld [vmem:[%s978_s8 + $0xd0] sm:$0xff] }
  0x1f   : > { %v317_v14 = vld [vmem:[%s978_s8 + $0xe0] sm:$0xff]  ;;  %314 = vst [vmem:[%s983_s9 + $0x60] sm:$0xff] %v313_v12  ;;  %316 = vst [vmem:[%s983_s9 + $0x68] sm:$0xff] %v315_v13  ;;  %v319_v15 = vld [vmem:[%s978_s8 + $0xf0] sm:$0xff] }
  0x20   : > { %318 = vst [vmem:[%s983_s9 + $0x70] sm:$0xff] %v317_v14  ;;  %v321_v16 = vld [vmem:[%s978_s8 + $0x100] sm:$0xff]  ;;  %v323_v17 = vld [vmem:[%s978_s8 + $0x110] sm:$0xff]  ;;  %320 = vst [vmem:[%s983_s9 + $0x78] sm:$0xff] %v319_v15 }
  0x21   : > { %322 = vst [vmem:[%s983_s9 + $0x80] sm:$0xff] %v321_v16  ;;  %324 = vst [vmem:[%s983_s9 + $0x88] sm:$0xff] %v323_v17  ;;  %v325_v18 = vld [vmem:[%s978_s8 + $0x120] sm:$0xff]  ;;  %v327_v19 = vld [vmem:[%s978_s8 + $0x130] sm:$0xff] }
  0x22   : > { %v329_v20 = vld [vmem:[%s978_s8 + $0x140] sm:$0xff]  ;;  %326 = vst [vmem:[%s983_s9 + $0x90] sm:$0xff] %v325_v18  ;;  %328 = vst [vmem:[%s983_s9 + $0x98] sm:$0xff] %v327_v19  ;;  %v331_v21 = vld [vmem:[%s978_s8 + $0x150] sm:$0xff] }
  0x23   : > { %330 = vst [vmem:[%s983_s9 + $0xa0] sm:$0xff] %v329_v20  ;;  %v333_v22 = vld [vmem:[%s978_s8 + $0x160] sm:$0xff]  ;;  %v335_v23 = vld [vmem:[%s978_s8 + $0x170] sm:$0xff]  ;;  %332 = vst [vmem:[%s983_s9 + $0xa8] sm:$0xff] %v331_v21 }
  0x24   : > { %334 = vst [vmem:[%s983_s9 + $0xb0] sm:$0xff] %v333_v22  ;;  %336 = vst [vmem:[%s983_s9 + $0xb8] sm:$0xff] %v335_v23  ;;  %v337_v24 = vld [vmem:[%s978_s8 + $0x180] sm:$0xff]  ;;  %v339_v25 = vld [vmem:[%s978_s8 + $0x190] sm:$0xff] }
  0x25   : > { %v341_v26 = vld [vmem:[%s978_s8 + $0x1a0] sm:$0xff]  ;;  %338 = vst [vmem:[%s983_s9 + $0xc0] sm:$0xff] %v337_v24  ;;  %340 = vst [vmem:[%s983_s9 + $0xc8] sm:$0xff] %v339_v25  ;;  %v343_v27 = vld [vmem:[%s978_s8 + $0x1b0] sm:$0xff] }
  0x26   : > { %342 = vst [vmem:[%s983_s9 + $0xd0] sm:$0xff] %v341_v26  ;;  %v345_v28 = vld [vmem:[%s978_s8 + $0x1c0] sm:$0xff]  ;;  %v347_v29 = vld [vmem:[%s978_s8 + $0x1d0] sm:$0xff]  ;;  %344 = vst [vmem:[%s983_s9 + $0xd8] sm:$0xff] %v343_v27 }
  0x27   : > { %346 = vst [vmem:[%s983_s9 + $0xe0] sm:$0xff] %v345_v28  ;;  %348 = vst [vmem:[%s983_s9 + $0xe8] sm:$0xff] %v347_v29  ;;  %v349_v30 = vld [vmem:[%s978_s8 + $0x1e0] sm:$0xff]  ;;  %v351_v31 = vld [vmem:[%s978_s8 + $0x1f0] sm:$0xff] }
  0x28   : > { %350 = vst [vmem:[%s983_s9 + $0xf0] sm:$0xff] %v349_v30  ;;  %352 = vst [vmem:[%s983_s9 + $0xf8] sm:$0xff] %v351_v31 }
  0x29 PF: > { %p677_p11 = scmp.ge.s32.totalorder %s887_s20, 1  ;;  %p363_p12 = scmp.lt.s32.totalorder %s887_s20, 3 }
  0x2b   : > { %p364_p13 = pnand %p677_p11, %p363_p12 }
  0x2c   : > { %s1049_s10 = sand.u32 (!%p364_p13), 1, %s871_s16   ;;  %v420_v32 = vld [vmem:[%s1154_s0 + $0x8] sm:$0xff] (!%p364_p13)  ;;  %v523_v33 = vld [vmem:[%s1156_s2] sm:$0xff] (!%p364_p13)  ;;  %v889_v34 = vmov (!%p364_p13), 0   ;;  %p416_p0 = scmp.lt.s32.totalorder (!%p364_p13), %s879_s18, 1 }
  0x2d   : > { %367 = sbr.rel (%p364_p13) target bundleno = 313 (0x139), region = 70  ;;  %s678_s21 = sshll.u32 (!%p364_p13), %s1049_s10, 8  ;;  %517 = vmatprep.mubr.f32.mxu0 (!%p364_p13), %v420_v32  ;;  %808 = vset.pattern.permute.xlu0 (!%p364_p13), %v889_v34  ;;  %v419_v19 = vld [vmem:[%s1154_s0] sm:$0xff] (!%p364_p13) }
  0x2e   : > { %527 = vperm.xlu0 (!%p364_p13), %808, %v523_v33   ;;  %s1058_s22 = scalar_lea.vmem (!%p364_p13), [#allocation2], %s678_s21  ;;  %s679_s7 = sshll.u32 (!%p364_p13), %s1049_s10, 3 }
  0x2f   : > { %v437_v35 = vld [vmem:[%s1058_s22 + $0x80] sm:$0xff] (!%p364_p13)  ;;  %v438_v36 = vld [vmem:[%s1058_s22 + $0x88] sm:$0xff] (!%p364_p13)  ;;  %v439_v40 = vld [vmem:[%s1058_s22 + $0x90] sm:$0xff] (!%p364_p13)  ;;  %s682_s8 = sshll.u32 (!%p364_p13), %s879_s18, 7  ;;  %s406_s9 = scalar_lea.vmem (!%p364_p13), [#allocation3], %s679_s7 }
  0x30   : > { %v421_v37 = vld [vmem:[%s1058_s22] sm:$0xff] (!%p364_p13)  ;;  %v720_v38 = vpack.c.bf16 (!%p364_p13), %v438_v36, %v437_v35  ;;  %v422_v39 = vld [vmem:[%s1058_s22 + $0x8] sm:$0xff] (!%p364_p13)  ;;  %v440_v41 = vld [vmem:[%s1058_s22 + $0x98] sm:$0xff] (!%p364_p13)  ;;  %s555_s11 = sshll.u32 (!%p364_p13), %s406_s9, 4  ;;  %s1105_s14 = scalar_lea.hbm (!%p364_p13), %s1158_s4, %s682_s8  ;;  %s1107_s11 = int_to_ptr.vmem [resolvable:$true] %s555_s11 }
  0x31   : > { %v722_v42 = vpack.c.bf16 (!%p364_p13), %v422_v39, %v421_v37  ;;  %v724_v43 = vpack.c.bf16 (!%p364_p13), %v440_v41, %v439_v40  ;;  %v423_v44 = vld [vmem:[%s1058_s22 + $0x10] sm:$0xff] (!%p364_p13)  ;;  %v424_v45 = vld [vmem:[%s1058_s22 + $0x18] sm:$0xff] (!%p364_p13)  ;;  %v441_v46 = vld [vmem:[%s1058_s22 + $0xa0] sm:$0xff] (!%p364_p13)  ;;  %s540_s21 = scalar_lea.sflag (!%p364_p13), [#allocation4], %s1049_s10 }
  0x32   : > { %721 = vmatprep.subr.bf16.mxu0 (!%p364_p13), %v720_v38  ;;  %v442_v47 = vld [vmem:[%s1058_s22 + $0xa8] sm:$0xff] (!%p364_p13)  ;;  %v726_v48 = vpack.c.bf16 (!%p364_p13), %v424_v45, %v423_v44  ;;  %v425_v50 = vld [vmem:[%s1058_s22 + $0x20] sm:$0xff] (!%p364_p13)  ;;  %v443_v52 = vld [vmem:[%s1058_s22 + $0xb0] sm:$0xff] (!%p364_p13) }
  0x33   : > { %723 = vmatpush3.bf16.msra.mxu0 (!%p364_p13), %v722_v42  ;;  %v728_v49 = vpack.c.bf16 (!%p364_p13), %v442_v47, %v441_v46  ;;  %v426_v51 = vld [vmem:[%s1058_s22 + $0x28] sm:$0xff] (!%p364_p13)  ;;  %v444_v53 = vld [vmem:[%s1058_s22 + $0xb8] sm:$0xff] (!%p364_p13)  ;;  %v427_v56 = vld [vmem:[%s1058_s22 + $0x30] sm:$0xff] (!%p364_p13) }
  0x34   : > { %725 = vmatprep.subr.bf16.mxu0 %v724_v43  ;;  %v730_v54 = vpack.c.bf16 %v426_v51, %v425_v50  ;;  %v732_v55 = vpack.c.bf16 %v444_v53, %v443_v52  ;;  %v428_v57 = vld [vmem:[%s1058_s22 + $0x38] sm:$0xff]  ;;  %v445_v58 = vld [vmem:[%s1058_s22 + $0xc0] sm:$0xff]  ;;  %v446_v59 = vld [vmem:[%s1058_s22 + $0xc8] sm:$0xff]  ;;  %s417_s29 = scalar_select %p416_p0, %s879_s18, 1 }
  0x35   : > { %v734_v60 = vpack.c.bf16 %v428_v57, %v427_v56  ;;  %v736_v61 = vpack.c.bf16 %v446_v59, %v445_v58  ;;  %v429_v62 = vld [vmem:[%s1058_s22 + $0x40] sm:$0xff]  ;;  %v430_v63 = vld [vmem:[%s1058_s22 + $0x48] sm:$0xff]  ;;  %v447_v0 = vld [vmem:[%s1058_s22 + $0xd0] sm:$0xff]  ;;  %s890_s18 = smov [#allocation3]  }
  0x36   : > { %v448_v1 = vld [vmem:[%s1058_s22 + $0xd8] sm:$0xff]  ;;  %v738_v2 = vpack.c.bf16 %v430_v63, %v429_v62  ;;  %v431_v4 = vld [vmem:[%s1058_s22 + $0x50] sm:$0xff]  ;;  %v449_v6 = vld [vmem:[%s1058_s22 + $0xe0] sm:$0xff]  ;;  %s418_s6 = scalar_lea.vmem %s1157_s3, %s417_s29  ;;  %s813_s24 = sshll.u32 %s890_s18, 4  ;;  %s814_s24 = int_to_ptr.vmem [resolvable:$false] %s813_s24 }
  0x37   : > { %727 = vmatpush3.bf16.msra.mxu0 %v726_v48  ;;  %v740_v3 = vpack.c.bf16 %v448_v1, %v447_v0  ;;  %v432_v5 = vld [vmem:[%s1058_s22 + $0x58] sm:$0xff]  ;;  %v450_v7 = vld [vmem:[%s1058_s22 + $0xe8] sm:$0xff]  ;;  %v433_v10 = vld [vmem:[%s1058_s22 + $0x60] sm:$0xff]  ;;  %s815_s26 = scalar_lea.vmem %s814_s24, 256  ;;  %p816_p4 = scmp.lt.s32.totalorder %s1107_s11, %s814_s24 }
  0x38   : > { %729 = vmatprep.subr.bf16.mxu0 %v728_v49  ;;  %v742_v8 = vpack.c.bf16 %v432_v5, %v431_v4  ;;  %v744_v9 = vpack.c.bf16 %v450_v7, %v449_v6  ;;  %v434_v11 = vld [vmem:[%s1058_s22 + $0x68] sm:$0xff]  ;;  %v451_v12 = vld [vmem:[%s1058_s22 + $0xf0] sm:$0xff]  ;;  %v452_v13 = vld [vmem:[%s1058_s22 + $0xf8] sm:$0xff] }
  0x39   : > { %v746_v14 = vpack.c.bf16 %v434_v11, %v433_v10  ;;  %v748_v15 = vpack.c.bf16 %v452_v13, %v451_v12  ;;  %v435_v16 = vld [vmem:[%s1058_s22 + $0x70] sm:$0xff]  ;;  %v436_v17 = vld [vmem:[%s1058_s22 + $0x78] sm:$0xff]  ;;  %v680_v21 = vld [vmem:[%s418_s6] ss:$0 sm:$0xff]  ;;  %s809_s22 = scalar_lea.vmem %s1107_s11, 128 }
  0x3a   : > { %v750_v18 = vpack.c.bf16 %v436_v17, %v435_v16  ;;  %p810_p1 = scmp.ne.s32.totalorder %s1107_s11, %s809_s22  ;;  %p817_p6 = scmp.lt.s32.totalorder %s815_s26, %s809_s22 }
  0x3b   : > { %731 = vmatpush3.bf16.msra.mxu0 %v730_v54 }
  0x3c   : > { %733 = vmatprep.subr.bf16.mxu0 %v732_v55  ;;  %p811_p2 = pnand %p810_p1, %p955_p5  ;;  %p818_p7 = por %p817_p6, %p816_p4 }
  0x3e   : > { %p812_p3 = pneg %p811_p2 }
  0x3f   : > { %735 = vmatpush3.bf16.msra.mxu0 %v734_v60 }
  0x40   : > { %737 = vmatprep.subr.bf16.mxu0 %v736_v61  ;;  %p819_p8 = pnand %p818_p7, %p812_p3 }
  0x43   : > { %739 = vmatpush3.bf16.msra.mxu0 %v738_v2 }
  0x44   : > { %741 = vmatprep.subr.bf16.mxu0 %v740_v3 }
  0x47   : > { %743 = vmatpush3.bf16.msra.mxu0 %v742_v8 }
  0x48   : > { %745 = vmatprep.subr.bf16.mxu0 %v744_v9 }
  0x4b   : > { %747 = vmatpush3.bf16.msra.mxu0 %v746_v14 }
  0x4c   : > { %749 = vmatprep.subr.bf16.mxu0 %v748_v15 }
  0x4f   : > { %751 = vmatpush3.bf16.msra.mxu0 %v750_v18 }
  0x52   : > { %518 = vmatmul.mubr.f32.vlgmr.msra.gmra.mrb[0].mxu0 %v419_v19 }
  0xad   : > { %v528_v20 = vpop.permute.xlu0 %527 }
  0xae   : > { %v536_v23 = vmul.f32 %v680_v21, %v528_v20 }
 0x125   : > { %v717_v22 = vpop.f32.mrb[0].mxu0 }
 0x126   : > { %v718_v24 = vpop.f32.mrb[1].mxu0 }
 0x127   : > { %v719_v25 = vadd.f32 %v718_v24, %v717_v22 }
 0x129   : > { %v537_v26 = vmul.f32 %v719_v25, %v536_v23 }
 0x12b   : > { %538 = vst [vmem:[%s406_s9] sm:$0xff] %v537_v26 }
 0x12c   : > { %822 = shalt.err (!%p819_p8)
}
 0x12d   : > { %s823_s10 = scalar_lea.hbm %s1105_s14, 128  ;;  %s827_s5 = scalar_lea.hbm %s1158_s4, 256 }
 0x12e   : > { %p824_p11 = scmp.ne.s32.totalorder %s1105_s14, %s823_s10  ;;  %p828_p0 = scmp.lt.u32.totalorder %s1105_s14, %s1158_s4 }
 0x12f   : > { %p829_p1 = scmp.lt.u32.totalorder %s827_s5, %s823_s10  ;;  %p831_p3 = scmp.lt.u32.totalorder %s823_s10, %s1105_s14 }
 0x130   : > { %p825_p12 = pnand %p824_p11, %p955_p5 }
 0x131   : > { %p830_p2 = por %p829_p1, %p828_p0 }
 0x132   : > { %p826_p13 = pneg %p825_p12 }
 0x133   : > { %p832_p4 = por %p831_p3, %p830_p2 }
 0x135   : > { %p833_p6 = pnand %p832_p4, %p826_p13 }
 0x137   : > { %836 = shalt.err (!%p833_p6)
}
 0x138   : > { %752 = dma.vmem_to_hbm [thread:$0]  (%p955_p5), %s1107_s11, 128, %s1105_s14, %s540_s21  }
 0x139 PF: > { %s567_s8 = sand.u32 1, %s867_s15   ;;  %p755_p7 = pnand %p674_p10, %p966_p9 }
 0x13a   : > { %s568_s9 = scalar_lea.sflag [#allocation4], %s567_s8 }
 0x13b   : > { %862 = dma.done.wait (!%p755_p7), %s568_s9, 128  }
 0x13c   : > { %864 = vsyncadd (!%p755_p7), %s568_s9, 4294967168  ;;  %s17_s20 = sadd.s32 1, %s887_s20   ;;  %s1161_s15 = smov %s871_s16 }
 0x13d   : > { %p14_p8 = scmp.ge.s32.totalorder %s17_s20, 4   ;;  %s1162_s16 = smov %s875_s17 }
 0x13e   : > { %s1163_s17 = smov %s964_s27  ;;  %s1164_s18 = smov %s883_s19 }
 0x13f   : > { %s1165_s19 = smov %s1167_s23  ;;  %16 = sbr.rel (!%p14_p8) target bundleno = 4 (0x4), region = 123 }
 0x146   :  { %573 = vsyncpa [#allocation4], 1 }
 0x147   :  { %575 = vsyncpa [#allocation4 + $0x1], 1 }

</bundles_post_ra>
